<compile_context>
chip_gen: v6e
topology: v6e:2x2x1
jax: 0.10.0
libtpu: 0.0.40
codegen_flags: <defaults>
</compile_context>

<pallas_src>
import math

import jax
import jax.numpy as jnp
from jax.experimental import pallas as pl
from jax.experimental.pallas import tpu as pltpu

HIDDEN = 100          # true hidden width of each head (nn.Linear(num_inputs, 100))
HPAD = 128            # padded hidden width per head (lane aligned)


def _round_up(x, m):
    return (x + m - 1) // m * m


def _next_pow2(x):
    return 1 << (max(int(x), 1) - 1).bit_length()


def actor_critic_kernel(x_ref, w1_ref, b1_ref, w2_ref, b2_ref,
                        nmask_ref, vmask_ref, out_ref):
    x = x_ref[...]                                                  # (bb, num_inputs)

    # Fused layer 1, both heads: (bb, 2*HPAD); critic lanes [0:HPAD), actor [HPAD:2*HPAD)
    h = jnp.dot(x, w1_ref[...], preferred_element_type=jnp.float32) + b1_ref[...]
    h = jnp.maximum(h, 0.0)                                         # ReLU (padded lanes stay 0)

    # Fused layer 2: (bb, out_pad); lane 0 = value, lanes 1..1+A = actor logits
    z = jnp.dot(h, w2_ref[...], preferred_element_type=jnp.float32) + b2_ref[...]

    # Stable masked softmax over the logit lanes only: additive -1e30 mask on the
    # value lane and padding lanes (precomputed, VMEM-resident) -> exp underflows to 0.
    logits = z + nmask_ref[...]
    m = jnp.max(logits, axis=-1, keepdims=True)
    e = jnp.exp(logits - m)
    denom = jnp.sum(e, axis=-1, keepdims=True)
    probs = e / denom                                               # exact divide (sum == 1)

    # Packed output: value in lane 0 (probs there is exactly 0), probs in 1..1+A.
    out_ref[...] = probs + z * vmask_ref[...]


def actor_critic_forward(states, packed, num_actions, *, block_b=1024):
    """states: (num_inputs,) or (B, num_inputs) float32.

    Returns (value (B,1), probs (B,num_actions)); B == 1 for a single state,
    matching `state.unsqueeze(0)` semantics of the PyTorch forward.
    """
    states = jnp.asarray(states, jnp.float32)
    if states.ndim == 1:
        states = states[None, :]
    B, num_inputs = states.shape
    out_pad = packed["w2"].shape[1]

    # Batch block: multiple of 8 sublanes, as big as block_b; split so the grid
    # has >= 2 steps whenever the batch allows it (keeps both v7x TCs busy).
    bb = min(block_b, _round_up(B, 8))
    bb = max(8, (bb // 8) * 8)
    b_pad = _round_up(B, bb)
    if b_pad // bb < 2 and B >= 16:
        bb = max(8, _round_up(b_pad // 2, 8))
        b_pad = _round_up(B, bb)
    if b_pad != B:
        states = jnp.pad(states, ((0, b_pad - B), (0, 0)))
    grid = (b_pad // bb,)

    w1, b1, w2, b2 = packed["w1"], packed["b1"], packed["w2"], packed["b2"]
    neg_mask, val_mask = packed["neg_mask"], packed["val_mask"]

    # Advisory cost hint (whole call) for XLA's scheduler around the custom call.
    flops = 2 * b_pad * (num_inputs * w1.shape[1] + w2.shape[0] * out_pad)
    bytes_accessed = 4 * (b_pad * num_inputs + b_pad * out_pad + w1.size + b1.size
                          + w2.size + b2.size + neg_mask.size + val_mask.size)
    cost = pl.CostEstimate(flops=flops, transcendentals=b_pad * out_pad,
                           bytes_accessed=bytes_accessed)

    # Raise the scoped-VMEM limit only when a large swept tile would need it.
    resident = 4 * (w1.size + b1.size + w2.size + b2.size + neg_mask.size + val_mask.size)
    vmem_need = 2 * 4 * bb * (num_inputs + out_pad) + 2 * resident   # double-buffered
    compiler_kwargs = dict(dimension_semantics=("parallel",))
    if vmem_need > 14 * 1024 * 1024:
        compiler_kwargs["vmem_limit_bytes"] = int(min(2 * vmem_need, 60 * 1024 * 1024))

    out = pl.pallas_call(
        actor_critic_kernel,
        out_shape=jax.ShapeDtypeStruct((b_pad, out_pad), jnp.float32),
        grid=grid,
        in_specs=[
            pl.BlockSpec((bb, num_inputs), lambda i: (i, 0)),     # states (tiled over batch)
            pl.BlockSpec(w1.shape, lambda i: (0, 0)),             # fused W1 (VMEM-resident)
            pl.BlockSpec(b1.shape, lambda i: (0, 0)),             # fused b1
            pl.BlockSpec(w2.shape, lambda i: (0, 0)),             # fused W2
            pl.BlockSpec(b2.shape, lambda i: (0, 0)),             # fused b2
            pl.BlockSpec(neg_mask.shape, lambda i: (0, 0)),       # additive softmax mask
            pl.BlockSpec(val_mask.shape, lambda i: (0, 0)),       # value-lane select mask
        ],
        out_specs=pl.BlockSpec((bb, out_pad), lambda i: (i, 0)),
        compiler_params=pltpu.CompilerParams(**compiler_kwargs),
        cost_estimate=cost,
    )(states, w1, b1, w2, b2, neg_mask, val_mask)

    value = out[:B, 0:1]
    probs = out[:B, 1:1 + num_actions]
    return value, probs


def init_params(key, num_inputs, num_actions):
    """Deterministic init mimicking nn.Linear's U(-1/sqrt(fan_in), 1/sqrt(fan_in))."""
    keys = jax.random.split(key, 8)

    def linear(kw, kb, fan_in, fan_out):
        bound = 1.0 / math.sqrt(fan_in)
        w = jax.random.uniform(kw, (fan_in, fan_out), jnp.float32, -bound, bound)
        b = jax.random.uniform(kb, (1, fan_out), jnp.float32, -bound, bound)
        return w, b

    cw1, cb1 = linear(keys[0], keys[1], num_inputs, HIDDEN)
    cw2, cb2 = linear(keys[2], keys[3], HIDDEN, 1)
    aw1, ab1 = linear(keys[4], keys[5], num_inputs, HIDDEN)
    aw2, ab2 = linear(keys[6], keys[7], HIDDEN, num_actions)
    return dict(cw1=cw1, cb1=cb1, cw2=cw2, cb2=cb2,
                aw1=aw1, ab1=ab1, aw2=aw2, ab2=ab2)


def pack_params(p, num_inputs, num_actions):
    """Fuse & lane-pad both heads into two matmuls' worth of weights + lane masks."""
    out_pad = max(8, _next_pow2(1 + num_actions))   # minimal packed output width

    w1 = jnp.zeros((num_inputs, 2 * HPAD), jnp.float32)
    w1 = w1.at[:, :HIDDEN].set(p["cw1"]).at[:, HPAD:HPAD + HIDDEN].set(p["aw1"])

    b1 = jnp.zeros((1, 2 * HPAD), jnp.float32)       # padded-lane bias stays 0 (ReLU(0)=0)
    b1 = b1.at[:, :HIDDEN].set(p["cb1"]).at[:, HPAD:HPAD + HIDDEN].set(p["ab1"])

    w2 = jnp.zeros((2 * HPAD, out_pad), jnp.float32)
    w2 = w2.at[:HIDDEN, 0:1].set(p["cw2"])
    w2 = w2.at[HPAD:HPAD + HIDDEN, 1:1 + num_actions].set(p["aw2"])

    b2 = jnp.zeros((1, out_pad), jnp.float32)
    b2 = b2.at[:, 0:1].set(p["cb2"]).at[:, 1:1 + num_actions].set(p["ab2"])

    lane = jnp.arange(out_pad)[None, :]
    is_logit = (lane >= 1) & (lane < 1 + num_actions)
    neg_mask = jnp.where(is_logit, 0.0, -1e30).astype(jnp.float32)   # finite, no inf-inf risk
    val_mask = (lane == 0).astype(jnp.float32)

    return dict(w1=w1, b1=b1, w2=w2, b2=b2, neg_mask=neg_mask, val_mask=val_mask)


def reference_forward(states, p):
    s = jnp.asarray(states, jnp.float32)
    if s.ndim == 1:
        s = s[None, :]
    h = jax.nn.relu(s @ p["cw1"] + p["cb1"])
    value = h @ p["cw2"] + p["cb2"]
    a = jax.nn.relu(s @ p["aw1"] + p["ab1"])
    probs = jax.nn.softmax(a @ p["aw2"] + p["ab2"], axis=1)
    return value, probs


if __name__ == "__main__":
    num_inputs, num_actions = 32, 8

    key = jax.random.PRNGKey(0)
    k_params, k_state, k_batch = jax.random.split(key, 3)
    raw = init_params(k_params, num_inputs, num_actions)
    packed = pack_params(raw, num_inputs, num_actions)

    # ---- single state (matches PyTorch forward's state.unsqueeze(0)) --------
    state = jax.random.normal(k_state, (num_inputs,), jnp.float32)
    value, probs = actor_critic_forward(state, packed, num_actions)
    jax.block_until_ready((value, probs))

    v_ref, p_ref = reference_forward(state, raw)
    assert value.shape == (1, 1) and probs.shape == (1, num_actions)
    assert jnp.allclose(value, v_ref, atol=1e-4)
    assert jnp.allclose(probs, p_ref, atol=1e-4)

    # ---- small batch: exercises the >=2-grid-step (two 32-row tiles) path ----
    batch = jax.random.normal(k_batch, (64, num_inputs), jnp.float32)
    vb, pb = actor_critic_forward(batch, packed, num_actions)
    jax.block_until_ready((vb, pb))

    vb_ref, pb_ref = reference_forward(batch, raw)
    assert vb.shape == (64, 1) and pb.shape == (64, num_actions)
    assert jnp.allclose(vb, vb_ref, atol=1e-4)
    assert jnp.allclose(pb, pb_ref, atol=1e-4)
    assert jnp.allclose(jnp.sum(pb, axis=1), 1.0, atol=1e-4)
    assert bool(jnp.all(pb >= 0.0))

    print("KERNEL_OK")
</pallas_src>

<mosaic_0001>
module attributes {stable_mosaic.version = 11 : i64} {
  func.func @actor_critic_kernel(%arg0: i32, %arg1: memref<8x32xf32, #tpu.memory_space<vmem>>, %arg2: memref<32x256xf32, #tpu.memory_space<vmem>>, %arg3: memref<1x256xf32, #tpu.memory_space<vmem>>, %arg4: memref<256x16xf32, #tpu.memory_space<vmem>>, %arg5: memref<1x16xf32, #tpu.memory_space<vmem>>, %arg6: memref<1x16xf32, #tpu.memory_space<vmem>>, %arg7: memref<1x16xf32, #tpu.memory_space<vmem>>, %arg8: memref<8x16xf32, #tpu.memory_space<vmem>>) attributes {dimension_semantics = [#tpu.dimension_semantics<parallel>], iteration_bounds = array<i64: 1>, scalar_prefetch = 0 : i64, scratch_operands = 0 : i64, tpu.core_type = #tpu.core_type<tc>, window_params = [{transform_indices = @transform_0, window_bounds = array<i64: 8, 32>}, {pipeline_mode = #tpu.pipeline_mode<synchronous>, transform_indices = @transform_1, window_bounds = array<i64: 32, 256>}, {pipeline_mode = #tpu.pipeline_mode<synchronous>, transform_indices = @transform_2, window_bounds = array<i64: 1, 256>}, {pipeline_mode = #tpu.pipeline_mode<synchronous>, transform_indices = @transform_3, window_bounds = array<i64: 256, 16>}, {pipeline_mode = #tpu.pipeline_mode<synchronous>, transform_indices = @transform_4, window_bounds = array<i64: 1, 16>}, {pipeline_mode = #tpu.pipeline_mode<synchronous>, transform_indices = @transform_5, window_bounds = array<i64: 1, 16>}, {pipeline_mode = #tpu.pipeline_mode<synchronous>, transform_indices = @transform_6, window_bounds = array<i64: 1, 16>}, {transform_indices = @transform_7, window_bounds = array<i64: 8, 16>}]} {
    %c0 = arith.constant 0 : index
    %c0_0 = arith.constant 0 : index
    %0 = vector.load %arg1[%c0, %c0_0] : memref<8x32xf32, #tpu.memory_space<vmem>>, vector<8x32xf32>
    %c0_1 = arith.constant 0 : index
    %c0_2 = arith.constant 0 : index
    %1 = vector.load %arg2[%c0_1, %c0_2] : memref<32x256xf32, #tpu.memory_space<vmem>>, vector<32x256xf32>
    %cst = arith.constant dense<0.000000e+00> : vector<8x256xf32>
    %2 = tpu.matmul %0, %1, %cst {dimension_numbers = #tpu.dot_dimension_numbers<[1], [0], [0], [1], [0, 0, 1, 1], [], []>} : vector<8x32xf32>, vector<32x256xf32>, vector<8x256xf32> -> vector<8x256xf32>
    %c0_3 = arith.constant 0 : index
    %c0_4 = arith.constant 0 : index
    %3 = vector.load %arg3[%c0_3, %c0_4] : memref<1x256xf32, #tpu.memory_space<vmem>>, vector<1x256xf32>
    %4 = vector.broadcast %3 : vector<1x256xf32> to vector<8x256xf32>
    %5 = arith.addf %2, %4 : vector<8x256xf32>
    %cst_5 = arith.constant 0.000000e+00 : f32
    %6 = vector.broadcast %cst_5 : f32 to vector<8x256xf32>
    %7 = arith.maximumf %5, %6 : vector<8x256xf32>
    %c0_6 = arith.constant 0 : index
    %c0_7 = arith.constant 0 : index
    %8 = vector.load %arg4[%c0_6, %c0_7] : memref<256x16xf32, #tpu.memory_space<vmem>>, vector<256x16xf32>
    %cst_8 = arith.constant dense<0.000000e+00> : vector<8x16xf32>
    %9 = tpu.matmul %7, %8, %cst_8 {dimension_numbers = #tpu.dot_dimension_numbers<[1], [0], [0], [1], [0, 0, 1, 1], [], []>} : vector<8x256xf32>, vector<256x16xf32>, vector<8x16xf32> -> vector<8x16xf32>
    %c0_9 = arith.constant 0 : index
    %c0_10 = arith.constant 0 : index
    %10 = vector.load %arg5[%c0_9, %c0_10] : memref<1x16xf32, #tpu.memory_space<vmem>>, vector<1x16xf32>
    %11 = vector.broadcast %10 : vector<1x16xf32> to vector<8x16xf32>
    %12 = arith.addf %9, %11 : vector<8x16xf32>
    %c0_11 = arith.constant 0 : index
    %c0_12 = arith.constant 0 : index
    %13 = vector.load %arg6[%c0_11, %c0_12] : memref<1x16xf32, #tpu.memory_space<vmem>>, vector<1x16xf32>
    %14 = vector.broadcast %13 : vector<1x16xf32> to vector<8x16xf32>
    %15 = arith.addf %12, %14 : vector<8x16xf32>
    %cst_13 = arith.constant dense<0xFF800000> : vector<8xf32>
    %16 = vector.multi_reduction <maximumf>, %15, %cst_13 [1] : vector<8x16xf32> to vector<8xf32>
    %17 = vector.shape_cast %16 : vector<8xf32> to vector<8x1xf32>
    %18 = vector.broadcast %17 : vector<8x1xf32> to vector<8x16xf32>
    %19 = arith.subf %15, %18 : vector<8x16xf32>
    %20 = math.exp %19 : vector<8x16xf32>
    %cst_14 = arith.constant dense<0.000000e+00> : vector<8xf32>
    %21 = vector.multi_reduction <add>, %20, %cst_14 [1] : vector<8x16xf32> to vector<8xf32>
    %22 = vector.shape_cast %21 : vector<8xf32> to vector<8x1xf32>
    %23 = vector.broadcast %22 : vector<8x1xf32> to vector<8x16xf32>
    %24 = arith.divf %20, %23 : vector<8x16xf32>
    %c0_15 = arith.constant 0 : index
    %c0_16 = arith.constant 0 : index
    %25 = vector.load %arg7[%c0_15, %c0_16] : memref<1x16xf32, #tpu.memory_space<vmem>>, vector<1x16xf32>
    %26 = vector.broadcast %25 : vector<1x16xf32> to vector<8x16xf32>
    %27 = arith.mulf %12, %26 : vector<8x16xf32>
    %28 = arith.addf %24, %27 : vector<8x16xf32>
    %c0_17 = arith.constant 0 : index
    %c0_18 = arith.constant 0 : index
    %29 = vector.load %arg8[%c0_17, %c0_18] : memref<8x16xf32, #tpu.memory_space<vmem>>, vector<8x16xf32>
    tpu.vector_store %arg8[%c0_17, %c0_18], %28 {strides = array<i32>} : memref<8x16xf32, #tpu.memory_space<vmem>>, vector<8x16xf32>,
    return
  }
  func.func @transform_0(%arg0: i32) -> (i32, i32) {
    %c0_i32 = arith.constant 0 : i32
    %c0_i32_0 = arith.constant 0 : i32
    return %arg0, %c0_i32 : i32, i32
  }
  func.func @transform_1(%arg0: i32) -> (i32, i32) {
    %c0_i32 = arith.constant 0 : i32
    %c0_i32_0 = arith.constant 0 : i32
    %c0_i32_1 = arith.constant 0 : i32
    return %c0_i32, %c0_i32_0 : i32, i32
  }
  func.func @transform_2(%arg0: i32) -> (i32, i32) {
    %c0_i32 = arith.constant 0 : i32
    %c0_i32_0 = arith.constant 0 : i32
    %c0_i32_1 = arith.constant 0 : i32
    return %c0_i32, %c0_i32_0 : i32, i32
  }
  func.func @transform_3(%arg0: i32) -> (i32, i32) {
    %c0_i32 = arith.constant 0 : i32
    %c0_i32_0 = arith.constant 0 : i32
    %c0_i32_1 = arith.constant 0 : i32
    return %c0_i32, %c0_i32_0 : i32, i32
  }
  func.func @transform_4(%arg0: i32) -> (i32, i32) {
    %c0_i32 = arith.constant 0 : i32
    %c0_i32_0 = arith.constant 0 : i32
    %c0_i32_1 = arith.constant 0 : i32
    return %c0_i32, %c0_i32_0 : i32, i32
  }
  func.func @transform_5(%arg0: i32) -> (i32, i32) {
    %c0_i32 = arith.constant 0 : i32
    %c0_i32_0 = arith.constant 0 : i32
    %c0_i32_1 = arith.constant 0 : i32
    return %c0_i32, %c0_i32_0 : i32, i32
  }
  func.func @transform_6(%arg0: i32) -> (i32, i32) {
    %c0_i32 = arith.constant 0 : i32
    %c0_i32_0 = arith.constant 0 : i32
    %c0_i32_1 = arith.constant 0 : i32
    return %c0_i32, %c0_i32_0 : i32, i32
  }
  func.func @transform_7(%arg0: i32) -> (i32, i32) {
    %c0_i32 = arith.constant 0 : i32
    %c0_i32_0 = arith.constant 0 : i32
    return %arg0, %c0_i32 : i32, i32
  }
}

</mosaic_0001>

<bundles_post_ra>
// kernel: tpu_custom_call.1
= control target key start
LH: loop header
LB: loop body
LE: loop exit
PB: predicated region body
PF: predicated region fallthrough
CT: control target
= control target key end

     0   :  { %v345_v4 = vmov 0.0   ;;  %vm48_vm0 = vcmask 261120   ;;  %s528_s0 = inlined_call_operand.vmem [shape: f32[8,32], index: 0, kind: input, shape index: {}]   ;;  %s529_s1 = inlined_call_operand.vmem [shape: f32[32,256], index: 1, kind: input, shape index: {}]   ;;  %s530_s2 = inlined_call_operand.vmem [shape: f32[1,256], index: 2, kind: input, shape index: {}]   ;;  %s531_s3 = inlined_call_operand.vmem [shape: f32[256,16], index: 3, kind: input, shape index: {}]   ;;  %s532_s4 = inlined_call_operand.vmem [shape: f32[1,16], index: 4, kind: input, shape index: {}]   ;;  %s533_s5 = inlined_call_operand.vmem [shape: f32[1,16], index: 5, kind: input, shape index: {}]   ;;  %s534_s6 = inlined_call_operand.vmem [shape: f32[1,16], index: 6, kind: input, shape index: {}]   ;;  %s535_s7 = inlined_call_operand.hbm [shape: f32[8,16], index: 7, kind: output, shape index: {}]  }
   0x1   :  { %v35_v0 = vld [vmem:[%s529_s1 + $0x38] sm:$0xff]  ;;  %v34_v1 = vld [vmem:[%s529_s1 + $0x30] sm:$0xff]  ;;  %v33_v2 = vld [vmem:[%s529_s1 + $0x28] sm:$0xff]  ;;  %116 = vmatprep.mubr.f32.mxu0 %v345_v4 }
   0x2   :  { %76 = vmatprep.subr.mxu0 %v35_v0  ;;  %v32_v3 = vld [vmem:[%s529_s1 + $0x20] sm:$0xff]  ;;  %v31_v5 = vld [vmem:[%s529_s1 + $0x18] sm:$0xff]  ;;  %v30_v6 = vld [vmem:[%s529_s1 + $0x10] sm:$0xff] }
   0x3   :  { %77 = vmatpush1.msra.mxu0 %v34_v1  ;;  %v156_v7 = vld [vmem:[%s531_s3 + $0xf8] sm:$0xff]  ;;  %v155_v9 = vld [vmem:[%s531_s3 + $0xf0] sm:$0xff]  ;;  %v29_v10 = vld [vmem:[%s529_s1 + $0x8] sm:$0xff] }
   0x4   :  { %78 = vmatprep.subr.mxu0 %v33_v2  ;;  %v140_v8 = vld [vmem:[%s531_s3 + $0x78] sm:$0xff]  ;;  %282 = vmatprep.subr.mxu1 %v156_v7  ;;  %v139_v11 = vld [vmem:[%s531_s3 + $0x70] sm:$0xff]  ;;  %v28_v12 = vld [vmem:[%s529_s1] sm:$0xff] }
   0x5   :  { %79 = vmatpush1.msra.mxu0 %v32_v3  ;;  %283 = vmatpush3.msra.mxu1 %v140_v8  ;;  %v154_v13 = vld [vmem:[%s531_s3 + $0xe8] sm:$0xff]  ;;  %v27_v14 = vld [vmem:[%s528_s0] sm:$0xff]  ;;  %v152_v18 = vld [vmem:[%s531_s3 + $0xd8] sm:$0xff] }
   0x6   :  { %80 = vmatprep.subr.mxu0 %v31_v5  ;;  %284 = vmatprep.subr.mxu1 %v155_v9  ;;  %v138_v15 = vld [vmem:[%s531_s3 + $0x68] sm:$0xff]  ;;  %v153_v16 = vld [vmem:[%s531_s3 + $0xe0] sm:$0xff]  ;;  %v136_v19 = vld [vmem:[%s531_s3 + $0x58] sm:$0xff] }
   0x7   :  { %81 = vmatpush1.msra.mxu0 %v30_v6  ;;  %285 = vmatpush3.msra.mxu1 %v139_v11  ;;  %v137_v17 = vld [vmem:[%s531_s3 + $0x60] sm:$0xff]  ;;  %v151_v20 = vld [vmem:[%s531_s3 + $0xd0] sm:$0xff] }
   0x8   :  { %82 = vmatprep.subr.mxu0 %v29_v10  ;;  %286 = vmatprep.subr.mxu1 %v154_v13 }
   0x9   :  { %83 = vmatpush1.msra.mxu0 %v28_v12  ;;  %287 = vmatpush3.msra.mxu1 %v138_v15 }
   0xa   :  { %278 = vmatmul.mubr.msk.f32.vlgmr.msra.gmra.mxu0 %vm48_vm0, %v27_v14  ;;  %288 = vmatprep.subr.mxu1 %v153_v16 }
   0xb   :  { %289 = vmatpush3.msra.mxu1 %v137_v17 }
   0xc   :  { %12 = vsyncpa [#allocation3], 0  ;;  %290 = vmatprep.subr.mxu1 %v152_v18  ;;  %v135_v21 = vld [vmem:[%s531_s3 + $0x50] sm:$0xff]  ;;  %v150_v22 = vld [vmem:[%s531_s3 + $0xc8] sm:$0xff]  ;;  %v38_v42 = vlaneseq  ;;  %vm242_vm1 = vcmask 130048  }
   0xd   :  { %291 = vmatpush3.msra.mxu1 %v136_v19  ;;  %v134_v23 = vld [vmem:[%s531_s3 + $0x48] sm:$0xff]  ;;  %v149_v24 = vld [vmem:[%s531_s3 + $0xc0] sm:$0xff]  ;;  %v148_v26 = vld [vmem:[%s531_s3 + $0xb8] sm:$0xff] }
   0xe   :  { %292 = vmatprep.subr.mxu1 %v151_v20  ;;  %v133_v25 = vld [vmem:[%s531_s3 + $0x40] sm:$0xff]  ;;  %v132_v27 = vld [vmem:[%s531_s3 + $0x38] sm:$0xff]  ;;  %v147_v28 = vld [vmem:[%s531_s3 + $0xb0] sm:$0xff]  ;;  %v39_v43 = vshrl.u32 %v38_v42, 7 }
   0xf   :  { %293 = vmatpush3.msra.mxu1 %v135_v21  ;;  %v131_v29 = vld [vmem:[%s531_s3 + $0x30] sm:$0xff]  ;;  %v146_v30 = vld [vmem:[%s531_s3 + $0xa8] sm:$0xff]  ;;  %v145_v32 = vld [vmem:[%s531_s3 + $0xa0] sm:$0xff] }
  0x10   :  { %294 = vmatprep.subr.mxu1 %v150_v22  ;;  %v130_v31 = vld [vmem:[%s531_s3 + $0x28] sm:$0xff]  ;;  %v129_v33 = vld [vmem:[%s531_s3 + $0x20] sm:$0xff]  ;;  %v144_v34 = vld [vmem:[%s531_s3 + $0x98] sm:$0xff]  ;;  %v40_v44 = vsub.s32 0, %v39_v43  ;;  %v44_v46 = vsub.s32 1, %v39_v43 }
  0x11   :  { %295 = vmatpush3.msra.mxu1 %v134_v23  ;;  %v128_v35 = vld [vmem:[%s531_s3 + $0x18] sm:$0xff]  ;;  %v143_v36 = vld [vmem:[%s531_s3 + $0x90] sm:$0xff]  ;;  %v142_v38 = vld [vmem:[%s531_s3 + $0x88] sm:$0xff] }
  0x12   :  { %296 = vmatprep.subr.mxu1 %v149_v24  ;;  %v127_v37 = vld [vmem:[%s531_s3 + $0x10] sm:$0xff]  ;;  %v126_v39 = vld [vmem:[%s531_s3 + $0x8] sm:$0xff]  ;;  %v141_v40 = vld [vmem:[%s531_s3 + $0x80] sm:$0xff] }
  0x13   :  { %297 = vmatpush3.msra.mxu1 %v133_v25  ;;  %v125_v41 = vld [vmem:[%s531_s3] sm:$0xff] }
  0x14   :  { %298 = vmatprep.subr.mxu1 %v148_v26  ;;  %v36_v45 = vld [vmem:[%s530_s2] sm:$0x3] }
  0x15   :  { %299 = vmatpush3.msra.mxu1 %v132_v27  ;;  %v41_v47 = vrot.slane %v36_v45, %v40_v44  ;;  %v45_v48 = vrot.slane %v36_v45, %v44_v46  ;;  %v279_v56 = vld [vmem:[%s532_s4] ss:$0 sm:$0xff] }
  0x16   :  { %300 = vmatprep.subr.mxu1 %v147_v28  ;;  %v280_v59 = vld [vmem:[%s533_s5] ss:$0 sm:$0xff]  ;;  %s346_s5 = smov [#allocation2]  }
  0x17   :  { %301 = vmatpush3.msra.mxu1 %v131_v29  ;;  %v281_v5 = vld [vmem:[%s534_s6] ss:$0 sm:$0xff]  ;;  %s270_s13 = sshll.u32 %s346_s5, 4  ;;  %s271_s13 = int_to_ptr.vmem [resolvable:$true] %s270_s13 }
  0x18   :  { %302 = vmatprep.subr.mxu1 %v146_v30  ;;  %s323_s14 = scalar_lea.vmem %s271_s13, 128  ;;  %p328_p1 = scmp.lt.s32.totalorder %s271_s13, %s271_s13 }
  0x19   :  { %303 = vmatpush3.msra.mxu1 %v130_v31  ;;  %p324_p0 = scmp.ne.s32.totalorder %s271_s13, %s323_s14  ;;  %p329_p2 = scmp.lt.s32.totalorder %s323_s14, %s323_s14 }
  0x1a   :  { %304 = vmatprep.subr.mxu1 %v145_v32 }
  0x1b   :  { %305 = vmatpush3.msra.mxu1 %v129_v33  ;;  %p330_p3 = por %p329_p2, %p328_p1 }
  0x1c   :  { %306 = vmatprep.subr.mxu1 %v144_v34 }
  0x1d   :  { %307 = vmatpush3.msra.mxu1 %v128_v35  ;;  %p331_p4 = pnand %p330_p3, %p324_p0 }
  0x1e   :  { %308 = vmatprep.subr.mxu1 %v143_v36 }
  0x1f   :  { %309 = vmatpush3.msra.mxu1 %v127_v37 }
  0x20   :  { %310 = vmatprep.subr.mxu1 %v142_v38 }
  0x21   :  { %311 = vmatpush3.msra.mxu1 %v126_v39 }
  0x22   :  { %312 = vmatprep.subr.mxu1 %v141_v40 }
  0x23   :  { %313 = vmatpush3.msra.mxu1 %v125_v41 }
  0xca   :  { %v118_v49 = vpop.f32.mrf.mxu0 }
  0xcb   :  { %v119_v50 = vadd.f32 %v118_v49, %v41_v47 }
  0xcc   :  { %v120_v51 = vpop.f32.mrf.mxu0 }
  0xcd   :  { %v121_v52 = vadd.f32 %v120_v51, %v45_v48  ;;  %v123_v54 = vmax.f32 %v119_v50, 0.0 }
  0xcf   :  { %v124_v53 = vmax.f32 %v121_v52, 0.0 }
  0xd1   :  { %228 = vmatprep.mubr.f32.mxu1 %v124_v53 }
  0xd2   :  { %229 = vmatmul.mubr.f32.vlgmr.msra.gmra.mxu1 %v123_v54 }
 0x192   :  { %v314_v55 = vpop.f32.mrf.mxu1 }
 0x194   :  { %v315_v57 = vpop.f32.mrf.mxu1 }
 0x195   :  { %v316_v58 = vadd.f32 %v315_v57, %v314_v55 }
 0x197   :  { %v231_v60 = vadd.f32 %v316_v58, %v279_v56 }
 0x199   :  { %v241_v61 = vadd.f32 %v280_v59, %v231_v60  ;;  %v261_v7 = vmul.f32 %v281_v5, %v231_v60 }
 0x19b   :  { %v243_v62 = vsel %vm242_vm1, %v241_v61, -inf }
 0x19c   :  { %244 = vmax.xlane.f32.xlu0 %v243_v62 }
 0x225   :  { %v245_v63 = vpop.xlane.xlu0 %244 }
 0x226   :  { %v246_v0 = vsub.f32 %v241_v61, %v245_v63 }
 0x228   :  { %v247_v1 = vmul.f32 1.442695, %v246_v0 }
 0x22a   :  { %319 = vpow2.f32 %v247_v1 }
 0x237   :  { %v320_v2 = vpop.eup %319 }
 0x238   :  { %v249_v3 = vsel %vm242_vm1, %v320_v2, 0.0 }
 0x239   :  { %250 = vadd.xlane.f32.xlu0 %v249_v3 }
 0x2c2   :  { %v251_v4 = vpop.xlane.xlu0 %250 }
 0x2c3   :  { %321 = vrcp.f32 %v251_v4 }
 0x2d0   :  { %v322_v6 = vpop.eup %321 }
 0x2d1   :  { %v253_v8 = vmul.f32 %v322_v6, %v320_v2 }
 0x2d3   :  { %v262_v9 = vadd.f32 %v261_v7, %v253_v8 }
 0x2d5   :  { %263 = vst.msk [vmem:[#allocation2] sm:$0xff] %vm242_vm1, %v262_v9 }
 0x2d6   :  { %334 = shalt.err (!%p331_p4)
}
 0x2d7   :  { %273 = dma.vmem_to_hbm [thread:$0]  %s271_s13, 128, %s535_s7, [#allocation3]  }
 0x2d8   :  { %343 = dma.done.wait [#allocation3], 128  }
 0x2d9   :  { %344 = vsyncadd [#allocation3], 4294967168 }
 0x2da   :  { %277 = vsyncpa [#allocation3], 1 }

</bundles_post_ra>
